<compile_context>
chip_gen: v6e
topology: v6e:2x2x1
jax: 0.10.0
libtpu: 0.0.40
codegen_flags: <defaults>
</compile_context>

<pallas_src>
import jax
import jax.numpy as jnp
from jax.experimental import pallas as pl
from jax.experimental.pallas import tpu as pltpu


def _round_up(v, m):
    return ((v + m - 1) // m) * m


# ----------------------------------------------------------------------------
# Kernel: one (tb, d_in) node tile -> fc1 -> ReLU -> fc2 -> (tb, d_out) tile.
# ----------------------------------------------------------------------------
def _gnn_kernel(x_ref, w1t_ref, b1_ref, w2t_ref, b2_ref, o_ref):
    # fc1: bf16 x bf16 -> f32 accumulation on the MXU.
    x = x_ref[...].astype(w1t_ref.dtype)
    h = jnp.dot(x, w1t_ref[...], preferred_element_type=jnp.float32)
    # bias + ReLU in f32.
    h = jnp.maximum(h + b1_ref[...], 0.0)
    # fc2: cast hidden activation back to bf16 for the second MXU pass.
    y = jnp.dot(h.astype(w2t_ref.dtype), w2t_ref[...],
                preferred_element_type=jnp.float32)
    y = y + b2_ref[...]
    o_ref[...] = y.astype(o_ref.dtype)


# ----------------------------------------------------------------------------
# One-time parameter prep (hoisted out of the per-call path).
# PyTorch Linear stores W as (out, in); pre-transpose so the kernel issues
# plain row-major matmuls.  Weights in bf16 (MXU-native), biases in f32.
# ----------------------------------------------------------------------------
def prepare_params(params, *, compute_dtype=jnp.bfloat16):
    return {
        "w1t": jnp.asarray(params["w1"].T, compute_dtype),   # (d_in, hidden)
        "b1": jnp.asarray(params["b1"], jnp.float32).reshape(1, -1),
        "w2t": jnp.asarray(params["w2"].T, compute_dtype),   # (hidden, d_out)
        "b2": jnp.asarray(params["b2"], jnp.float32).reshape(1, -1),
    }


def _clamp_node_tile(node_tile, n, d_in, hidden, d_out, x_bytes, out_bytes,
                     w_bytes, budget_bytes):
    """Largest multiple-of-8 node tile whose double-buffered working set fits
    the VMEM budget (conservative so it also fits v7x's 64 MiB)."""
    resident = 2 * (d_in * hidden + hidden * d_out) * w_bytes \
        + 2 * (hidden + d_out) * 4                     # weights + biases (x2 buf)
    per_row = 2 * d_in * x_bytes + 2 * d_out * out_bytes \
        + hidden * 4 + 4 * max(d_in, d_out)            # streamed tiles + f32 h
    avail = max(budget_bytes - resident, per_row * 8)
    tb_max = max((avail // per_row) // 8 * 8, 8)
    tb = min(node_tile, tb_max, _round_up(n, 8))
    return max(_round_up(tb, 8), 8), resident, per_row


# ----------------------------------------------------------------------------
# Forward wrapper.
# ----------------------------------------------------------------------------
def gnn_forward(prepared, x, edge_index=None, *, node_tile=1024, out_dtype=None):
    """Pallas forward for GNN.  `edge_index` is accepted for API parity with
    the PyTorch signature but the reference forward never uses it."""
    del edge_index
    n, d_in = x.shape
    w1t, b1r = prepared["w1t"], prepared["b1"]
    w2t, b2r = prepared["w2t"], prepared["b2"]
    hidden = w1t.shape[1]
    d_out = w2t.shape[1]
    out_dtype = out_dtype if out_dtype is not None else x.dtype

    budget = 40 * 1024 * 1024      # safe on v5e/v6e (128 MiB) and v7x (64 MiB)
    tb, resident, per_row = _clamp_node_tile(
        node_tile, n, d_in, hidden, d_out,
        x_bytes=x.dtype.itemsize, out_bytes=jnp.dtype(out_dtype).itemsize,
        w_bytes=w1t.dtype.itemsize, budget_bytes=budget)
    grid_n = pl.cdiv(n, tb)        # trailing partial block handled by Pallas

    vmem_limit = int(min(max(resident + per_row * tb + (1 << 20), 32 << 20),
                         48 << 20))

    out = pl.pallas_call(
        _gnn_kernel,
        out_shape=jax.ShapeDtypeStruct((n, d_out), out_dtype),
        grid=(grid_n,),
        in_specs=[
            pl.BlockSpec((tb, d_in), lambda i: (i, 0)),       # x tile (streams)
            pl.BlockSpec((d_in, hidden), lambda i: (0, 0)),   # W1^T (resident)
            pl.BlockSpec((1, hidden), lambda i: (0, 0)),      # b1   (resident)
            pl.BlockSpec((hidden, d_out), lambda i: (0, 0)),  # W2^T (resident)
            pl.BlockSpec((1, d_out), lambda i: (0, 0)),       # b2   (resident)
        ],
        out_specs=pl.BlockSpec((tb, d_out), lambda i: (i, 0)),
        compiler_params=pltpu.CompilerParams(
            dimension_semantics=("parallel",),
            vmem_limit_bytes=vmem_limit),
    )(x, w1t, b1r, w2t, b2r)
    return out


def init_params(key, in_features, hidden, out_features):
    k1, k2, k3, k4 = jax.random.split(key, 4)
    scale = 0.05
    return {
        "w1": jax.random.normal(k1, (hidden, in_features), jnp.float32) * scale,
        "b1": jax.random.normal(k2, (hidden,), jnp.float32) * scale,
        "w2": jax.random.normal(k3, (out_features, hidden), jnp.float32) * scale,
        "b2": jax.random.normal(k4, (out_features,), jnp.float32) * scale,
    }


if __name__ == "__main__":
    N, D_IN, HIDDEN, D_OUT = 32, 64, 128, 64
    key = jax.random.PRNGKey(0)
    kx, kp = jax.random.split(key)
    x = jax.random.normal(kx, (N, D_IN), jnp.float32)
    # edge_index is part of the forward signature but unused by the reference.
    edge_index = jnp.array([[0, 1, 2], [1, 2, 3]], dtype=jnp.int32)
    params = init_params(kp, D_IN, HIDDEN, D_OUT)
    prepared = prepare_params(params)          # one-time bf16 weight prep

    out = gnn_forward(prepared, x, edge_index)
    out = jax.block_until_ready(out)

    # Pure-JAX f32 reference (fc2(relu(fc1(x)))).
    ref = jnp.maximum(x @ params["w1"].T + params["b1"], 0.0) \
        @ params["w2"].T + params["b2"]
    assert out.shape == (N, D_OUT)
    assert out.dtype == x.dtype
    assert bool(jnp.all(jnp.isfinite(out)))
    # bf16 MXU inputs with f32 accumulation: tolerance loosened accordingly.
    assert bool(jnp.allclose(out, ref, atol=2e-2, rtol=2e-2))
    print("KERNEL_OK")
</pallas_src>

<mosaic_0001>
module attributes {stable_mosaic.version = 11 : i64} {
  func.func @_gnn_kernel(%arg0: i32, %arg1: memref<32x64xf32, #tpu.memory_space<vmem>>, %arg2: memref<64x128xbf16, #tpu.memory_space<vmem>>, %arg3: memref<1x128xf32, #tpu.memory_space<vmem>>, %arg4: memref<128x64xbf16, #tpu.memory_space<vmem>>, %arg5: memref<1x64xf32, #tpu.memory_space<vmem>>, %arg6: memref<32x64xf32, #tpu.memory_space<vmem>>) attributes {dimension_semantics = [#tpu.dimension_semantics<parallel>], iteration_bounds = array<i64: 1>, scalar_prefetch = 0 : i64, scratch_operands = 0 : i64, tpu.core_type = #tpu.core_type<tc>, window_params = [{transform_indices = @transform_0, window_bounds = array<i64: 32, 64>}, {pipeline_mode = #tpu.pipeline_mode<synchronous>, transform_indices = @transform_1, window_bounds = array<i64: 64, 128>}, {pipeline_mode = #tpu.pipeline_mode<synchronous>, transform_indices = @transform_2, window_bounds = array<i64: 1, 128>}, {pipeline_mode = #tpu.pipeline_mode<synchronous>, transform_indices = @transform_3, window_bounds = array<i64: 128, 64>}, {pipeline_mode = #tpu.pipeline_mode<synchronous>, transform_indices = @transform_4, window_bounds = array<i64: 1, 64>}, {transform_indices = @transform_5, window_bounds = array<i64: 32, 64>}]} {
    %c0 = arith.constant 0 : index
    %c0_0 = arith.constant 0 : index
    %0 = vector.load %arg1[%c0, %c0_0] : memref<32x64xf32, #tpu.memory_space<vmem>>, vector<32x64xf32>
    %1 = arith.truncf %0 : vector<32x64xf32> to vector<32x64xbf16>
    %c0_1 = arith.constant 0 : index
    %c0_2 = arith.constant 0 : index
    %2 = vector.load %arg2[%c0_1, %c0_2] : memref<64x128xbf16, #tpu.memory_space<vmem>>, vector<64x128xbf16>
    %cst = arith.constant dense<0.000000e+00> : vector<32x128xf32>
    %3 = tpu.matmul %1, %2, %cst {dimension_numbers = #tpu.dot_dimension_numbers<[1], [0], [0], [1], [0, 0, 1, 1], [], []>} : vector<32x64xbf16>, vector<64x128xbf16>, vector<32x128xf32> -> vector<32x128xf32>
    %c0_3 = arith.constant 0 : index
    %c0_4 = arith.constant 0 : index
    %4 = vector.load %arg3[%c0_3, %c0_4] : memref<1x128xf32, #tpu.memory_space<vmem>>, vector<1x128xf32>
    %5 = vector.broadcast %4 : vector<1x128xf32> to vector<32x128xf32>
    %6 = arith.addf %3, %5 : vector<32x128xf32>
    %cst_5 = arith.constant 0.000000e+00 : f32
    %7 = vector.broadcast %cst_5 : f32 to vector<32x128xf32>
    %8 = arith.maximumf %6, %7 : vector<32x128xf32>
    %9 = arith.truncf %8 : vector<32x128xf32> to vector<32x128xbf16>
    %c0_6 = arith.constant 0 : index
    %c0_7 = arith.constant 0 : index
    %10 = vector.load %arg4[%c0_6, %c0_7] : memref<128x64xbf16, #tpu.memory_space<vmem>>, vector<128x64xbf16>
    %cst_8 = arith.constant dense<0.000000e+00> : vector<32x64xf32>
    %11 = tpu.matmul %9, %10, %cst_8 {dimension_numbers = #tpu.dot_dimension_numbers<[1], [0], [0], [1], [0, 0, 1, 1], [], []>} : vector<32x128xbf16>, vector<128x64xbf16>, vector<32x64xf32> -> vector<32x64xf32>
    %c0_9 = arith.constant 0 : index
    %c0_10 = arith.constant 0 : index
    %12 = vector.load %arg5[%c0_9, %c0_10] : memref<1x64xf32, #tpu.memory_space<vmem>>, vector<1x64xf32>
    %13 = vector.broadcast %12 : vector<1x64xf32> to vector<32x64xf32>
    %14 = arith.addf %11, %13 : vector<32x64xf32>
    %c0_11 = arith.constant 0 : index
    %c0_12 = arith.constant 0 : index
    %15 = vector.load %arg6[%c0_11, %c0_12] : memref<32x64xf32, #tpu.memory_space<vmem>>, vector<32x64xf32>
    tpu.vector_store %arg6[%c0_11, %c0_12], %14 {strides = array<i32>} : memref<32x64xf32, #tpu.memory_space<vmem>>, vector<32x64xf32>,
    return
  }
  func.func @transform_0(%arg0: i32) -> (i32, i32) {
    %c0_i32 = arith.constant 0 : i32
    %c0_i32_0 = arith.constant 0 : i32
    return %arg0, %c0_i32 : i32, i32
  }
  func.func @transform_1(%arg0: i32) -> (i32, i32) {
    %c0_i32 = arith.constant 0 : i32
    %c0_i32_0 = arith.constant 0 : i32
    %c0_i32_1 = arith.constant 0 : i32
    return %c0_i32, %c0_i32_0 : i32, i32
  }
  func.func @transform_2(%arg0: i32) -> (i32, i32) {
    %c0_i32 = arith.constant 0 : i32
    %c0_i32_0 = arith.constant 0 : i32
    %c0_i32_1 = arith.constant 0 : i32
    return %c0_i32, %c0_i32_0 : i32, i32
  }
  func.func @transform_3(%arg0: i32) -> (i32, i32) {
    %c0_i32 = arith.constant 0 : i32
    %c0_i32_0 = arith.constant 0 : i32
    %c0_i32_1 = arith.constant 0 : i32
    return %c0_i32, %c0_i32_0 : i32, i32
  }
  func.func @transform_4(%arg0: i32) -> (i32, i32) {
    %c0_i32 = arith.constant 0 : i32
    %c0_i32_0 = arith.constant 0 : i32
    %c0_i32_1 = arith.constant 0 : i32
    return %c0_i32, %c0_i32_0 : i32, i32
  }
  func.func @transform_5(%arg0: i32) -> (i32, i32) {
    %c0_i32 = arith.constant 0 : i32
    %c0_i32_0 = arith.constant 0 : i32
    return %arg0, %c0_i32 : i32, i32
  }
}

</mosaic_0001>

<bundles_post_ra>
// kernel: tpu_custom_call.1
= control target key start
LH: loop header
LB: loop body
LE: loop exit
PB: predicated region body
PF: predicated region fallthrough
CT: control target
= control target key end

     0   :  { %vm67_vm0 = vcmask 523264   ;;  %s466_s0 = inlined_call_operand.vmem [shape: f32[32,64], index: 0, kind: input, shape index: {}]   ;;  %s467_s1 = inlined_call_operand.vmem [shape: bf16[64,128], index: 1, kind: input, shape index: {}]   ;;  %s468_s2 = inlined_call_operand.vmem [shape: f32[1,128], index: 2, kind: input, shape index: {}]   ;;  %s469_s3 = inlined_call_operand.vmem [shape: bf16[128,64], index: 3, kind: input, shape index: {}]   ;;  %s470_s4 = inlined_call_operand.vmem [shape: f32[1,64], index: 4, kind: input, shape index: {}]   ;;  %s471_s5 = inlined_call_operand.hbm [shape: f32[32,64], index: 5, kind: output, shape index: {}]  }
   0x1   :  { %v336_v0 = vld [vmem:[%s467_s1 + $0x18] sm:$0xff]   ;;  %v337_v1 = vld [vmem:[%s467_s1 + $0x10] sm:$0xff]   ;;  %v338_v2 = vld [vmem:[%s467_s1 + $0x8] sm:$0xff]  }
   0x2   :  { %301 = vmatprep.subr.bf16.mxu0 %v336_v0  ;;  %v22_v3 = vld [vmem:[%s466_s0] sm:$0xff]  ;;  %v23_v4 = vld [vmem:[%s466_s0 + $0x8] sm:$0xff]  ;;  %v340_v6 = vld [vmem:[%s469_s3 + $0x38] sm:$0xff]  }
   0x3   :  { %302 = vmatpush3.bf16.msra.mxu0 %v336_v0  ;;  %v26_v5 = vpack.c.bf16 %v23_v4, %v22_v3  ;;  %v341_v7 = vld [vmem:[%s469_s3 + $0x30] sm:$0xff]   ;;  %v339_v8 = vld [vmem:[%s467_s1] sm:$0xff]   ;;  %313 = vmatprep.subr.bf16.mxu1 %v340_v6  ;;  %v25_v10 = vld [vmem:[%s466_s0 + $0x18] sm:$0xff] }
   0x4   :  { %303 = vmatprep.subr.bf16.mxu0 %v337_v1  ;;  %v24_v9 = vld [vmem:[%s466_s0 + $0x10] sm:$0xff]  ;;  %314 = vmatpush3.bf16.msra.mxu1 %v340_v6  ;;  %v342_v11 = vld [vmem:[%s469_s3 + $0x28] sm:$0xff]  }
   0x5   :  { %309 = vmatprep.mubr.msk.bf16.mxu0 %vm67_vm0, %v26_v5  ;;  %315 = vmatprep.subr.bf16.mxu1 %v341_v7 }
   0x7   :  { %304 = vmatpush3.bf16.msra.mxu0 %v337_v1 }
   0x8   :  { %305 = vmatprep.subr.bf16.mxu0 %v338_v2 }
   0xb   :  { %306 = vmatpush3.bf16.msra.mxu0 %v338_v2 }
   0xc   :  { %307 = vmatprep.subr.bf16.mxu0 %v339_v8 }
   0xd   :  { %10 = vsyncpa [#allocation3], 0  ;;  %316 = vmatpush3.bf16.msra.mxu1 %v341_v7  ;;  %v27_v12 = vpack.c.bf16 %v25_v10, %v24_v9  ;;  %v343_v13 = vld [vmem:[%s469_s3 + $0x20] sm:$0xff]   ;;  %v344_v14 = vld [vmem:[%s469_s3 + $0x18] sm:$0xff]  }
   0xe   :  { %317 = vmatprep.subr.bf16.mxu1 %v342_v11  ;;  %v345_v15 = vld [vmem:[%s469_s3 + $0x10] sm:$0xff]   ;;  %v346_v16 = vld [vmem:[%s469_s3 + $0x8] sm:$0xff]   ;;  %v347_v17 = vld [vmem:[%s469_s3] sm:$0xff]  }
   0xf   :  { %308 = vmatpush3.bf16.msra.mxu0 %v339_v8  ;;  %v269_v20 = vld [vmem:[%s468_s2] ss:$0 sm:$0xff]  ;;  %s370_s2 = smov [#allocation2]  }
  0x10   :  { %v276_v33 = vld [vmem:[%s470_s4] ss:$0 sm:$0xff]  ;;  %s258_s26 = sshll.u32 %s370_s2, 4  ;;  %s259_s26 = int_to_ptr.vmem [resolvable:$true] %s258_s26 }
  0x11   :  { %318 = vmatpush3.bf16.msra.mxu1 %v342_v11  ;;  %s348_s4 = scalar_lea.vmem %s259_s26, 512  ;;  %p353_p1 = scmp.lt.s32.totalorder %s259_s26, %s259_s26 }
  0x12   :  { %310 = vmatmul.mubr.msk.bf16.vlgmr.msra.gmra.mxu0 %vm67_vm0, %v27_v12  ;;  %319 = vmatprep.subr.bf16.mxu1 %v343_v13  ;;  %p349_p0 = scmp.ne.s32.totalorder %s259_s26, %s348_s4  ;;  %p354_p2 = scmp.lt.s32.totalorder %s348_s4, %s348_s4 }
  0x14   :  { %p355_p3 = por %p354_p2, %p353_p1 }
  0x15   :  { %320 = vmatpush3.bf16.msra.mxu1 %v343_v13 }
  0x16   :  { %321 = vmatprep.subr.bf16.mxu1 %v344_v14  ;;  %p356_p4 = pnand %p355_p3, %p349_p0 }
  0x19   :  { %322 = vmatpush3.bf16.msra.mxu1 %v344_v14 }
  0x1a   :  { %323 = vmatprep.subr.bf16.mxu1 %v345_v15 }
  0x1d   :  { %324 = vmatpush3.bf16.msra.mxu1 %v345_v15 }
  0x1e   :  { %325 = vmatprep.subr.bf16.mxu1 %v346_v16 }
  0x21   :  { %326 = vmatpush3.bf16.msra.mxu1 %v346_v16 }
  0x22   :  { %327 = vmatprep.subr.bf16.mxu1 %v347_v17 }
  0x25   :  { %328 = vmatpush3.bf16.msra.mxu1 %v347_v17 }
  0xd2   :  { %v311_v18 = vpop.f32.mrf.mxu0 }
  0xd3   :  { %v117_v24 = vadd.f32 %v311_v18, %v269_v20 }
  0xd4   :  { %v108_v19 = vpop.f32.mrf.mxu0 }
  0xd5   :  { %v109_v22 = vadd.f32 %v269_v20, %v108_v19  ;;  %v125_v30 = vmax.f32 %v117_v24, 0.0 }
  0xd6   :  { %v312_v21 = vpop.f32.mrf.mxu0 }
  0xd7   :  { %v120_v23 = vadd.f32 %v312_v21, %v269_v20  ;;  %v123_v28 = vmax.f32 %v109_v22, 0.0 }
  0xd8   :  { %v111_v25 = vpop.f32.mrf.mxu0 }
  0xd9   :  { %v112_v26 = vadd.f32 %v269_v20, %v111_v25  ;;  %v126_v27 = vmax.f32 %v120_v23, 0.0 }
  0xdb   :  { %v124_v29 = vmax.f32 %v112_v26, 0.0  ;;  %v128_v32 = vpack.c.bf16 %v126_v27, %v125_v30 }
  0xdd   :  { %v127_v31 = vpack.c.bf16 %v124_v29, %v123_v28 }
  0xdf   :  { %329 = vmatprep.mubr.bf16.mxu1 %v127_v31 }
  0xe0   :  { %330 = vmatmul.mubr.bf16.vlgmr.msra.gmra.mxu1 %v128_v32 }
 0x1a0   :  { %v331_v34 = vpop.f32.mrf.mxu1 }
 0x1a1   :  { %v243_v35 = vadd.f32 %v331_v34, %v276_v33 }
 0x1a2   :  { %v234_v36 = vpop.f32.mrf.mxu1 }
 0x1a3   :  { %251 = vst.msk [vmem:[#allocation2 + $0x10] sm:$0xff] %vm67_vm0, %v243_v35  ;;  %v235_v37 = vadd.f32 %v276_v33, %v234_v36 }
 0x1a4   :  { %v332_v38 = vpop.f32.mrf.mxu1 }
 0x1a5   :  { %249 = vst.msk [vmem:[#allocation2] sm:$0xff] %vm67_vm0, %v235_v37  ;;  %v246_v39 = vadd.f32 %v332_v38, %v276_v33 }
 0x1a6   :  { %v237_v40 = vpop.f32.mrf.mxu1 }
 0x1a7   :  { %252 = vst.msk [vmem:[#allocation2 + $0x18] sm:$0xff] %vm67_vm0, %v246_v39  ;;  %v238_v41 = vadd.f32 %v276_v33, %v237_v40 }
 0x1a9   :  { %250 = vst.msk [vmem:[#allocation2 + $0x8] sm:$0xff] %vm67_vm0, %v238_v41 }
 0x1aa   :  { %359 = shalt.err (!%p356_p4)
}
 0x1ab   :  { %s371_s27 = smov 128   ;;  %s372_s28 = smov 8  }
 0x1ac   :  { %264 = dma.vmem_to_hbm [thread:$0]  %s259_s26, 512, %s471_s5, [#allocation3], %s371_s27, %s371_s27, %s372_s28  }
 0x1ad   :  { %368 = dma.done.wait [#allocation3], 512  }
 0x1ae   :  { %369 = vsyncadd [#allocation3], 4294966784 }
 0x1af   :  { %268 = vsyncpa [#allocation3], 1 }

</bundles_post_ra>
